<compile_context>
chip_gen: v5e
topology: v5e:2x2
jax: 0.10.0
libtpu: 0.0.40
codegen_flags: <defaults>
</compile_context>

<pallas_src>
import functools

import jax
import jax.numpy as jnp
from jax.experimental import pallas as pl
from jax.experimental.pallas import tpu as pltpu


def focal_loss_kernel(x_ref, t_ref, a_ref, o_ref, *, gamma, tile_n,
                      tiles_per_slice, n_valid):
    c = pl.program_id(0)          # parallel slice (TensorCore) index
    i = pl.program_id(1)          # serial tile index within this slice

    @pl.when(i == 0)
    def _():
        o_ref[...] = jnp.zeros_like(o_ref)

    x = x_ref[...].astype(jnp.float32)        # (TILE_N, C) logits; f32 compute (v5e has no bf16 VPU/EUP)
    t = t_ref[...]                            # (TILE_N, 1) int32 target ids
    alpha = a_ref[...].astype(jnp.float32)    # (1, C) per-class alpha

    tn, ccls = x.shape

    # One boolean one-hot mask, reused for both the target logit and the alpha gather.
    col = jax.lax.broadcasted_iota(jnp.int32, (tn, ccls), 1)
    mask = col == t                                                   # (TILE_N, C) bool

    # log-softmax evaluated only at the target class:
    #   log_p = x_t - m - log(sum exp(x - m))
    m = jnp.max(x, axis=1, keepdims=True)                             # (TILE_N, 1)
    s = jnp.sum(jnp.exp(x - m), axis=1, keepdims=True)                # (TILE_N, 1)
    x_t = jnp.sum(jnp.where(mask, x, 0.0), axis=1, keepdims=True)     # (TILE_N, 1)
    log_p = x_t - m - jnp.log(s)                                      # (TILE_N, 1)
    probs = jnp.exp(log_p)                                            # (TILE_N, 1)

    alpha_sel = jnp.sum(jnp.where(mask, alpha, 0.0), axis=1, keepdims=True)  # (TILE_N, 1)

    # (1 - p)^gamma: integer gamma -> pure VPU multiplies; float gamma -> exp/log1p (EUP).
    one_minus_p = 1.0 - probs
    if float(gamma) == float(int(gamma)) and int(gamma) >= 0:
        focal = jnp.ones_like(one_minus_p)
        for _ in range(int(gamma)):
            focal = focal * one_minus_p
    else:
        focal = jnp.exp(jnp.float32(gamma) * jnp.log1p(-probs))

    batch_loss = -alpha_sel * focal * log_p                           # (TILE_N, 1)

    # Ragged tail + duplicated (clamped) tiles: SELECT (not multiply), so garbage / NaN / Inf
    # in rows past N of the clamped last block cannot propagate into the sum.
    g = c * tiles_per_slice + i                                       # unclamped global tile idx
    row = jax.lax.broadcasted_iota(jnp.int32, (tn, 1), 0) + g * tile_n
    batch_loss = jnp.where(row < n_valid, batch_loss, 0.0)

    # Per-slice partial sum accumulated in this slice's own resident output block.
    tile_sum = jnp.sum(batch_loss)
    o_ref[...] += jnp.full(o_ref.shape, tile_sum, dtype=jnp.float32)

    # TODO(synk): for tiny C on v7x/v6e, if the bundle dump shows EUP saturating on padded
    # lanes, repack logits lane-dense as (C, N) in the wrapper so exp runs on useful lanes.


def _vmem_capacity_bytes():
    try:
        info = pltpu.get_tpu_info()
        cap = getattr(info, "vmem_capacity_bytes", None)
        if cap:
            return int(cap)
    except Exception:
        pass
    return 64 << 20  # conservative default (v7x per-TC VMEM)


def focal_loss(inputs, targets, alpha, *, gamma=2.0, size_average=True, tile_n=None):
    """inputs: (N, C) logits (any float dtype); targets: (N,) int class ids;
    alpha: (C,), (C,1) or (1,C)."""
    N, C = inputs.shape
    x = inputs                                   # keep native dtype: bf16 DMAs half the bytes
    t = targets.reshape(N, 1).astype(jnp.int32)
    a = jnp.asarray(alpha).reshape(1, C).astype(jnp.float32)

    itemsize = jnp.dtype(x.dtype).itemsize
    sub = max(8, 32 // max(1, itemsize))         # sublane packing: 8 rows f32, 16 bf16, 32 int8

    # Per-chip VMEM budget: v5e/v6e have 128 MiB physical, v7x 64 MiB per TensorCore.
    vmem_cap = _vmem_capacity_bytes()
    if vmem_cap >= (96 << 20):                   # v5e / v6e
        target_block_bytes = 12 << 20
        vmem_limit = 96 << 20
    else:                                        # v7x
        target_block_bytes = 8 << 20
        vmem_limit = 48 << 20

    if tile_n is None:
        # Budget against lane-padded VMEM footprint per row: logits pad C up to a multiple
        # of 128 lanes; the int32 targets column also pads to 128 lanes.
        row_bytes = ((C + 127) // 128) * 128 * itemsize + 128 * 4
        tile_n = target_block_bytes // max(1, row_bytes)
    tile_n = max(sub, min(32768, (int(tile_n) // sub) * sub))
    tile_n = min(tile_n, max(sub, ((N + sub - 1) // sub) * sub))

    n_tiles = pl.cdiv(N, tile_n)
    # v7x megacore: one slice per TensorCore, each with its OWN accumulator block.
    # On single-core chips the slices just run serially (negligible overhead).
    num_slices = 2 if n_tiles >= 2 else 1
    tiles_per_slice = pl.cdiv(n_tiles, num_slices)

    def tile_map(c, i):
        # Clamp so the padded tail of a slice never issues a fully out-of-bounds DMA;
        # the in-kernel row mask zeroes the duplicated rows.
        return (jnp.minimum(c * tiles_per_slice + i, n_tiles - 1), 0)

    kernel = functools.partial(
        focal_loss_kernel,
        gamma=float(gamma),
        tile_n=int(tile_n),
        tiles_per_slice=int(tiles_per_slice),
        n_valid=int(N),
    )
    out = pl.pallas_call(
        kernel,
        # One (8, 128) accumulator block per slice; only [:, 0, 0] is meaningful.
        out_shape=jax.ShapeDtypeStruct((num_slices, 8, 128), jnp.float32),
        grid_spec=pltpu.PrefetchScalarGridSpec(
            num_scalar_prefetch=0,
            grid=(num_slices, tiles_per_slice),
            in_specs=[
                pl.BlockSpec((tile_n, C), tile_map),          # logits tile (native dtype)
                pl.BlockSpec((tile_n, 1), tile_map),          # targets tile
                pl.BlockSpec((1, C), lambda c, i: (0, 0)),    # alpha (resident)
            ],
            out_specs=pl.BlockSpec((1, 8, 128), lambda c, i: (c, 0, 0)),
        ),
        compiler_params=pltpu.CompilerParams(
            dimension_semantics=("parallel", "arbitrary"),
            vmem_limit_bytes=vmem_limit,
        ),
    )(x, t, a)

    loss = jnp.sum(out[:, 0, 0])
    if size_average:
        loss = loss / jnp.float32(N)
    return loss


def focal_loss_ref(inputs, targets, alpha, *, gamma=2.0, size_average=True):
    """Pure-JAX reference mirroring the PyTorch module."""
    N, C = inputs.shape
    p = jax.nn.softmax(inputs.astype(jnp.float32), axis=1)
    mask = jax.nn.one_hot(targets, C, dtype=jnp.float32)
    probs = jnp.sum(p * mask, axis=1, keepdims=True)
    a = jnp.asarray(alpha).reshape(C).astype(jnp.float32)[targets].reshape(N, 1)
    batch_loss = -a * jnp.power(1.0 - probs, gamma) * jnp.log(probs)
    return jnp.mean(batch_loss) if size_average else jnp.sum(batch_loss)


if __name__ == "__main__":
    key = jax.random.PRNGKey(0)
    k1, k2 = jax.random.split(key)

    # Small shapes consistent with the module: N samples, C classes.
    # N is deliberately NOT a multiple of the tile so ragged (unpadded) blocks are exercised,
    # and tile_n=16 forces several grid steps through both parallel slices' accumulators.
    N, C = 50, 4
    inputs = jax.random.normal(k1, (N, C), dtype=jnp.float32)
    targets = jax.random.randint(k2, (N,), 0, C, dtype=jnp.int32)
    # alpha defaults to ones(class_num, 1) in the module's __init__
    alpha = jnp.ones((C, 1), dtype=jnp.float32)

    loss = focal_loss(inputs, targets, alpha, gamma=2.0, size_average=True, tile_n=16)
    loss = jax.block_until_ready(loss)
    ref = focal_loss_ref(inputs, targets, alpha, gamma=2.0, size_average=True)
    assert jnp.allclose(loss, ref, rtol=1e-5, atol=1e-6), (loss, ref)

    # size_average=False (sum) path.
    loss_sum = focal_loss(inputs, targets, alpha, gamma=2.0, size_average=False, tile_n=16)
    loss_sum = jax.block_until_ready(loss_sum)
    ref_sum = focal_loss_ref(inputs, targets, alpha, gamma=2.0, size_average=False)
    assert jnp.allclose(loss_sum, ref_sum, rtol=1e-5, atol=1e-5), (loss_sum, ref_sum)

    # Native-dtype path: bf16 logits are DMA'd as bf16 (half the HBM traffic), f32 in-kernel.
    x_bf16 = inputs.astype(jnp.bfloat16)
    loss_bf16 = focal_loss(x_bf16, targets, alpha, gamma=2.0, size_average=True)
    loss_bf16 = jax.block_until_ready(loss_bf16)
    ref_bf16 = focal_loss_ref(x_bf16.astype(jnp.float32), targets, alpha,
                              gamma=2.0, size_average=True)
    assert jnp.allclose(loss_bf16, ref_bf16, rtol=1e-4, atol=1e-4), (loss_bf16, ref_bf16)

    print("KERNEL_OK")
</pallas_src>

<mosaic_0001>
module attributes {stable_mosaic.version = 11 : i64} {
  func.func @focal_loss_kernel(%arg0: i32, %arg1: i32, %arg2: memref<16x4xf32, #tpu.memory_space<vmem>>, %arg3: memref<16x1xi32, #tpu.memory_space<vmem>>, %arg4: memref<1x4xf32, #tpu.memory_space<vmem>>, %arg5: memref<1x8x128xf32, #tpu.memory_space<vmem>>) attributes {dimension_semantics = [#tpu.dimension_semantics<parallel>, #tpu.dimension_semantics<arbitrary>], iteration_bounds = array<i64: 2, 2>, scalar_prefetch = 0 : i64, scratch_operands = 0 : i64, tpu.core_type = #tpu.core_type<tc>, window_params = [{transform_indices = @transform_0, window_bounds = array<i64: 16, 4>}, {transform_indices = @transform_1, window_bounds = array<i64: 16, 1>}, {pipeline_mode = #tpu.pipeline_mode<synchronous>, transform_indices = @transform_2, window_bounds = array<i64: 1, 4>}, {transform_indices = @transform_3, window_bounds = array<i64: 1, 8, 128>}]} {
    %c0_i32 = arith.constant 0 : i32
    %0 = arith.cmpi eq, %arg1, %c0_i32 : i32
    %1 = arith.extui %0 : i1 to i32
    %c0_i32_0 = arith.constant 0 : i32
    %2 = arith.cmpi ne, %1, %c0_i32_0 : i32
    scf.if %2 {
      %cst_22 = arith.constant 0.000000e+00 : f32
      %57 = vector.broadcast %cst_22 : f32 to vector<1x8x128xf32>
      %c0_23 = arith.constant 0 : index
      %c0_24 = arith.constant 0 : index
      %c0_25 = arith.constant 0 : index
      %58 = vector.load %arg5[%c0_23, %c0_24, %c0_25] : memref<1x8x128xf32, #tpu.memory_space<vmem>>, vector<1x8x128xf32>
      tpu.vector_store %arg5[%c0_23, %c0_24, %c0_25], %57 {strides = array<i32>} : memref<1x8x128xf32, #tpu.memory_space<vmem>>, vector<1x8x128xf32>,
    } else {
    }
    %c0 = arith.constant 0 : index
    %c0_1 = arith.constant 0 : index
    %3 = vector.load %arg2[%c0, %c0_1] : memref<16x4xf32, #tpu.memory_space<vmem>>, vector<16x4xf32>
    %c0_2 = arith.constant 0 : index
    %c0_3 = arith.constant 0 : index
    %4 = vector.load %arg3[%c0_2, %c0_3] : memref<16x1xi32, #tpu.memory_space<vmem>>, vector<16x1xi32>
    %c0_4 = arith.constant 0 : index
    %c0_5 = arith.constant 0 : index
    %5 = vector.load %arg4[%c0_4, %c0_5] : memref<1x4xf32, #tpu.memory_space<vmem>>, vector<1x4xf32>
    %6 = tpu.iota {dimensions = array<i32: 1>} : vector<16x4xi32>
    %7 = vector.broadcast %4 : vector<16x1xi32> to vector<16x4xi32>
    %8 = arith.cmpi eq, %6, %7 : vector<16x4xi32>
    %cst = arith.constant dense<0xFF800000> : vector<16xf32>
    %9 = vector.multi_reduction <maximumf>, %3, %cst [1] : vector<16x4xf32> to vector<16xf32>
    %10 = vector.shape_cast %9 : vector<16xf32> to vector<16x1xf32>
    %11 = vector.broadcast %10 : vector<16x1xf32> to vector<16x4xf32>
    %12 = arith.subf %3, %11 : vector<16x4xf32>
    %13 = math.exp %12 : vector<16x4xf32>
    %cst_6 = arith.constant dense<0.000000e+00> : vector<16xf32>
    %14 = vector.multi_reduction <add>, %13, %cst_6 [1] : vector<16x4xf32> to vector<16xf32>
    %15 = vector.shape_cast %14 : vector<16xf32> to vector<16x1xf32>
    %cst_7 = arith.constant 0.000000e+00 : f32
    %16 = vector.broadcast %cst_7 : f32 to vector<16x4xf32>
    %17 = arith.select %8, %3, %16 : vector<16x4xi1>, vector<16x4xf32>
    %cst_8 = arith.constant dense<0.000000e+00> : vector<16xf32>
    %18 = vector.multi_reduction <add>, %17, %cst_8 [1] : vector<16x4xf32> to vector<16xf32>
    %19 = vector.shape_cast %18 : vector<16xf32> to vector<16x1xf32>
    %20 = arith.subf %19, %10 : vector<16x1xf32>
    %21 = math.log %15 : vector<16x1xf32>
    %22 = arith.subf %20, %21 : vector<16x1xf32>
    %23 = math.exp %22 : vector<16x1xf32>
    %cst_9 = arith.constant 0.000000e+00 : f32
    %24 = vector.shape_cast %5 : vector<1x4xf32> to vector<1x4xf32>
    %25 = vector.broadcast %24 : vector<1x4xf32> to vector<16x4xf32>
    %26 = vector.broadcast %cst_9 : f32 to vector<16x4xf32>
    %27 = arith.select %8, %25, %26 : vector<16x4xi1>, vector<16x4xf32>
    %cst_10 = arith.constant dense<0.000000e+00> : vector<16xf32>
    %28 = vector.multi_reduction <add>, %27, %cst_10 [1] : vector<16x4xf32> to vector<16xf32>
    %29 = vector.shape_cast %28 : vector<16xf32> to vector<16x1xf32>
    %cst_11 = arith.constant 1.000000e+00 : f32
    %30 = vector.broadcast %cst_11 : f32 to vector<16x1xf32>
    %31 = arith.subf %30, %23 : vector<16x1xf32>
    %cst_12 = arith.constant 1.000000e+00 : f32
    %32 = vector.broadcast %cst_12 : f32 to vector<16x1xf32>
    %33 = arith.mulf %32, %31 : vector<16x1xf32>
    %34 = arith.mulf %33, %31 : vector<16x1xf32>
    %cst_13 = arith.constant 0.000000e+00 : f32
    %35 = vector.broadcast %cst_13 : f32 to vector<16x1xf32>
    %36 = arith.subf %35, %29 : vector<16x1xf32>
    %37 = arith.mulf %36, %34 : vector<16x1xf32>
    %38 = arith.mulf %37, %22 : vector<16x1xf32>
    %c2_i32 = arith.constant 2 : i32
    %39 = arith.muli %arg0, %c2_i32 : i32
    %40 = arith.addi %39, %arg1 : i32
    %41 = tpu.iota {dimensions = array<i32: 0>} : vector<16x1xi32>
    %c16_i32 = arith.constant 16 : i32
    %42 = arith.muli %40, %c16_i32 : i32
    %43 = vector.broadcast %42 : i32 to vector<16x1xi32>
    %44 = arith.addi %41, %43 : vector<16x1xi32>
    %c50_i32 = arith.constant 50 : i32
    %45 = vector.broadcast %c50_i32 : i32 to vector<16x1xi32>
    %46 = arith.cmpi slt, %44, %45 : vector<16x1xi32>
    %cst_14 = arith.constant 0.000000e+00 : f32
    %47 = vector.broadcast %cst_14 : f32 to vector<16x1xf32>
    %48 = arith.select %46, %38, %47 : vector<16x1xi1>, vector<16x1xf32>
    %49 = vector.shape_cast %48 : vector<16x1xf32> to vector<1x16x1xf32>
    %cst_15 = arith.constant dense<0.000000e+00> : vector<1xf32>
    %50 = vector.multi_reduction <add>, %49, %cst_15 [1, 2] : vector<1x16x1xf32> to vector<1xf32>
    %51 = vector.shape_cast %50 : vector<1xf32> to vector<1x1x1xf32>
    %52 = vector.extract %51[0, 0, 0] : f32 from vector<1x1x1xf32>
    %c0_16 = arith.constant 0 : index
    %c0_17 = arith.constant 0 : index
    %c0_18 = arith.constant 0 : index
    %53 = vector.load %arg5[%c0_16, %c0_17, %c0_18] : memref<1x8x128xf32, #tpu.memory_space<vmem>>, vector<1x8x128xf32>
    %54 = vector.broadcast %52 : f32 to vector<1x8x128xf32>
    %55 = arith.addf %53, %54 : vector<1x8x128xf32>
    %c0_19 = arith.constant 0 : index
    %c0_20 = arith.constant 0 : index
    %c0_21 = arith.constant 0 : index
    %56 = vector.load %arg5[%c0_19, %c0_20, %c0_21] : memref<1x8x128xf32, #tpu.memory_space<vmem>>, vector<1x8x128xf32>
    tpu.vector_store %arg5[%c0_19, %c0_20, %c0_21], %55 {strides = array<i32>} : memref<1x8x128xf32, #tpu.memory_space<vmem>>, vector<1x8x128xf32>,
    return
  }
  func.func @transform_0(%arg0: i32, %arg1: i32) -> (i32, i32) {
    %c2_i32 = arith.constant 2 : i32
    %0 = arith.muli %arg0, %c2_i32 : i32
    %1 = arith.addi %0, %arg1 : i32
    %c3_i32 = arith.constant 3 : i32
    %2 = arith.minsi %1, %c3_i32 : i32
    %c0_i32 = arith.constant 0 : i32
    %c0_i32_0 = arith.constant 0 : i32
    return %2, %c0_i32 : i32, i32
  }
  func.func @transform_1(%arg0: i32, %arg1: i32) -> (i32, i32) {
    %c2_i32 = arith.constant 2 : i32
    %0 = arith.muli %arg0, %c2_i32 : i32
    %1 = arith.addi %0, %arg1 : i32
    %c3_i32 = arith.constant 3 : i32
    %2 = arith.minsi %1, %c3_i32 : i32
    %c0_i32 = arith.constant 0 : i32
    %c0_i32_0 = arith.constant 0 : i32
    return %2, %c0_i32 : i32, i32
  }
  func.func @transform_2(%arg0: i32, %arg1: i32) -> (i32, i32) {
    %c0_i32 = arith.constant 0 : i32
    %c0_i32_0 = arith.constant 0 : i32
    %c0_i32_1 = arith.constant 0 : i32
    return %c0_i32, %c0_i32_0 : i32, i32
  }
  func.func @transform_3(%arg0: i32, %arg1: i32) -> (i32, i32, i32) {
    %c0_i32 = arith.constant 0 : i32
    %c0_i32_0 = arith.constant 0 : i32
    %c0_i32_1 = arith.constant 0 : i32
    return %arg0, %c0_i32, %c0_i32_0 : i32, i32, i32
  }
}

</mosaic_0001>

<bundles_post_ra>
// kernel: tpu_custom_call.1
= control target key start
LH: loop header
LB: loop body
LE: loop exit
PB: predicated region body
PF: predicated region fallthrough
CT: control target
= control target key end

     0   :  { %8 = vsyncpa [#allocation3], 0  ;;  %s889_s0 = inlined_call_operand.vmem [shape: f32[50,4], index: 0, kind: input, shape index: {}]   ;;  %s890_s1 = inlined_call_operand.vmem [shape: s32[50,1], index: 1, kind: input, shape index: {}]   ;;  %s891_s2 = inlined_call_operand.vmem [shape: f32[1,4], index: 2, kind: input, shape index: {}]   ;;  %s892_s3 = inlined_call_operand.hbm [shape: f32[2,8,128], index: 3, kind: output, shape index: {}]  }
   0x1   :  { %10 = vsyncpa [#allocation3 + $0x1], 0  ;;  %s740_s12 = smov 0   ;;  %s742_s13 = smov 0  }
   0x2   :  { %s744_s14 = smov 0   ;;  %s746_s15 = smov 0  }
   0x3   :  { %s748_s16 = smov 0   ;;  %s750_s17 = smov 0  }
   0x4   :  { %s752_s18 = smov 0   ;;  %s754_s19 = smov 0  }
   0x5 LB: > { %s509_s20 = sadd.s32 4294967295, %s716_s19   ;;  %s510_s21 = sadd.s32 4294967294, %s716_s19   ;;  %s716_s19 = sphi %s754_s19, %s16_s19   ;;  %s712_s18 = sphi %s752_s18, %s901_s18   ;;  %s708_s17 = sphi %s750_s17, %s900_s17   ;;  %s704_s16 = sphi %s748_s16, %s899_s16   ;;  %s700_s15 = sphi %s746_s15, %s898_s15   ;;  %s696_s14 = sphi %s744_s14, %s897_s14   ;;  %s692_s13 = sphi %s742_s13, %s896_s13   ;;  %s688_s12 = sphi %s740_s12, %s895_s12  }
   0x6   : > { %s25_s22 = sadd.s32 1, %s708_s17  ;;  %s28_s23 = sadd.s32 1, %s712_s18 }
   0x7   : > { %p26_p0 = scmp.ge.s32.totalorder %s25_s22, 2  ;;  %p134_p1 = scmp.ne.s32.totalorder %s696_s14, %s692_s13 }
   0x8   : > { %p135_p2 = scmp.eq.s32.totalorder %s509_s20, 3  ;;  %p140_p4 = scmp.ne.s32.totalorder %s692_s13, %s688_s12 }
   0x9   : > { %s903_s22 = smov (%p26_p0, %s25_s22), 0  ;;  %s905_s23 = smov (!%p26_p0, %s28_s23), %s712_s18 }
   0xa   : > { %p789_p3 = por %p135_p2, %p134_p1  ;;  %p30_p5 = scmp.ge.s32.totalorder %s905_s23, 2 }
   0xb   : > { %p141_p6 = scmp.eq.s32.totalorder %s510_s21, 3  ;;  %p517_p7 = scmp.ge.s32.totalorder %s716_s19, 1 }
   0xc   : > { %p212_p8 = scmp.lt.s32.totalorder %s716_s19, 5  ;;  %s907_s23 = smov (%p30_p5, %s905_s23), 0 }
   0xd   : > { %p799_p9 = por %p141_p6, %p140_p4  ;;  %s121_s26 = ssub.s32 %s712_s18, %s907_s23 }
   0xe   : > { %p213_p10 = pnand %p517_p7, %p212_p8  ;;  %s124_s27 = sadd.s32 1, %s696_s14 }
   0xf   : > { %p122_p11 = scmp.eq.s32.totalorder %s121_s26, 0  ;;  %s254_s29 = sand.u32 (!%p213_p10), 1, %s692_s13  }
  0x10   : > { %216 = sbr.rel (%p213_p10) target bundleno = 502 (0x1f6), region = 32  ;;  %s519_s30 = sshll.u32 (!%p213_p10), %s704_s16, 1 }
  0x11   : > { %s807_s28 = scalar_select %p122_p11, %s696_s14, %s124_s27  }
  0x12   : > { %s518_s4 = sshll.u32 (!%p213_p10), %s254_s29, 3  ;;  %s814_s5 = sadd.s32 (!%p213_p10), %s700_s15, %s519_s30 }
  0x13   : > { %p259_p12 = scmp.lt.s32.totalorder (!%p213_p10), %s814_s5, 3  ;;  %s824_s27 = scalar_lea.vmem (!%p213_p10), [#allocation2], %s518_s4 }
  0x14   : > { %p525_p0 = scmp.ne.s32.totalorder (!%p213_p10), %s700_s15, 0 }
  0x15   : > { %s260_s6 = scalar_select %p259_p12, %s814_s5, 3 }
  0x17   : > { %s520_s7 = sshll.u32 %s260_s6, 1 }
  0x18   : > { %p266_p13 = scmp.lt.s32.totalorder %s520_s7, 6  ;;  %304 = sbr.rel (%p525_p0) target bundleno = 31 (0x1f), region = 36 }
  0x1a   : > { %s909_s7 = smov (!%p266_p13, %s520_s7), 6 }
  0x1b   : > { %s521_s8 = sshll.u32 %s909_s7, 3 }
  0x1c   : > { %s269_s11 = scalar_lea.vmem %s889_s0, %s521_s8  ;;  %s291_s26 = scalar_lea.vmem %s890_s1, %s521_s8 }
  0x1d   : > { %v718_v0 = vmov 0.0  }
  0x1e   : > { %305 = vst [vmem:[%s824_s27] sm:$0xff] %v718_v0 }
  0x1f PF: > { %v308_v1 = vld [vmem:[%s291_s26] sm:$0xff]  ;;  %vm321_vm0 = vcmask 31744   ;;  %v719_v3 = vmov 0   ;;  %v307_v5 = vld [vmem:[%s269_s11 + $0x8] sm:$0xff]  ;;  %v311_v8 = vlaneseq  ;;  %s527_s4 = sshll.u32 %s814_s5, 4  ;;  %vm394_vm5 = vcmask 7168  }
  0x20   : > { %v306_v2 = vld [vmem:[%s269_s11] sm:$0xff]  ;;  %607 = vset.pattern.permute.xlu1 %v719_v3  ;;  %608 = vset.pattern.permute.xlu0 %v719_v3  ;;  %v309_v6 = vld [vmem:[%s291_s26 + $0x8] sm:$0xff]  ;;  %v325_v7 = vsel %vm321_vm0, %v307_v5, -inf  ;;  %v387_v51 = vstv %s527_s4  ;;  %s529_s5 = sshll.u32 %s704_s16, 3  ;;  %s424_s9 = sshll.u32 %s824_s27, 4  ;;  %s425_s9 = int_to_ptr.vmem [resolvable:$true] %s424_s9 }
  0x21   : > { %v322_v4 = vsel %vm321_vm0, %v306_v2, -inf  ;;  %314 = vperm.xlu1 %607, %v308_v1   ;;  %v312_v9 = vand.u32 127, %v311_v8  ;;  %v609_v16 = vld [vmem:[%s891_s2] ss:$0 sm:$0xff]  ;;  %v384_v49 = vshrl.u32 %v311_v8, 7  ;;  %s422_s8 = scalar_lea.hbm %s892_s3, %s529_s5  ;;  %s412_s20 = scalar_lea.sflag [#allocation3], %s254_s29 }
  0x22   : > { %323 = vmax.xlane.f32.xlu0 %v322_v4  ;;  %s426_s10 = sshll.u32 %s422_s8, 4  ;;  %s642_s30 = scalar_lea.hbm %s892_s3, 16  ;;  %s427_s10 = int_to_ptr.hbm [resolvable:$true] %s426_s10 }
  0x23   : > { %v385_v52 = vadd.s32 8, %v384_v49  ;;  %v388_v56 = vadd.s32 %v387_v51, %v384_v49  ;;  %s636_s21 = sshra.s32 %s427_s10, 4  ;;  %s637_s21 = int_to_ptr.hbm [resolvable:$true] %s636_s21 }
  0x24   : > { %s638_s26 = scalar_lea.hbm %s637_s21, 8  ;;  %p643_p5 = scmp.lt.s32.totalorder %s637_s21, %s892_s3 }
  0x25   : > { %v389_v58 = vadd.s32 %v387_v51, %v385_v52  ;;  %vm390_vm3 = vcmp.lt.s32.totalorder %v388_v56, 50  ;;  %p639_p1 = scmp.ne.s32.totalorder %s637_s21, %s638_s26  ;;  %p644_p6 = scmp.lt.s32.totalorder %s642_s30, %s638_s26 }
  0x27   : > { %vm391_vm4 = vcmp.lt.s32.totalorder %v389_v58, 50  ;;  %p640_p2 = pnand %p639_p1, %p789_p3  ;;  %p645_p7 = por %p644_p6, %p643_p5 }
  0x29   : > { %317 = vperm.xlu1 %607, %v309_v6   ;;  %p641_p4 = pneg %p640_p2 }
  0x2a   : > { %326 = vmax.xlane.f32.xlu0 %v325_v7 }
  0x2b   : > { %p646_p8 = pnand %p645_p7, %p641_p4 }
  0x93   : > { %v315_v10 = vpop.permute.xlu1 %314 }
  0x94   : > { %vm319_vm1 = vcmp.eq.s32.totalorder %v312_v9, %v315_v10 }
  0x95   : > { %v324_v11 = vpop.xlane.xlu0 %323  ;;  %v340_v13 = vsel %vm319_vm1, %v306_v2, 0.0  ;;  %v363_v29 = vsel %vm319_vm1, %v609_v16, 0.0 }
  0x96   : > { %v328_v12 = vsub.f32 %v306_v2, %v324_v11  ;;  %v342_v14 = vsel %vm321_vm0, %v340_v13, 0.0  ;;  %v365_v30 = vsel %vm321_vm0, %v363_v29, 0.0 }
  0x97   : > { %343 = vadd.xlane.f32.xlu0 %v342_v14 }
  0x98   : > { %v330_v15 = vmul.f32 1.442695, %v328_v12  ;;  %v407_v12 = vld [vmem:[%s824_s27] sm:$0xff] }
  0x9a   : > { %610 = vpow2.f32 %v330_v15 }
  0x9b   : > { %v318_v17 = vpop.permute.xlu1 %317 }
  0x9c   : > { %vm320_vm2 = vcmp.eq.s32.totalorder %v312_v9, %v318_v17 }
  0x9d   : > { %v327_v18 = vpop.xlane.xlu0 %326  ;;  %v341_v20 = vsel %vm320_vm2, %v307_v5, 0.0  ;;  %v364_v21 = vsel %vm320_vm2, %v609_v16, 0.0 }
  0x9e   : > { %v329_v19 = vsub.f32 %v307_v5, %v327_v18  ;;  %v345_v22 = vsel %vm321_vm0, %v341_v20, 0.0  ;;  %v368_v23 = vsel %vm321_vm0, %v364_v21, 0.0 }
  0x9f   : > { %346 = vadd.xlane.f32.xlu1 %v345_v22  ;;  %369 = vadd.xlane.f32.xlu0 %v368_v23 }
  0xa0   : > { %v611_v24 = vpop.eup %610  ;;  %v332_v25 = vmul.f32 1.442695, %v329_v19 }
  0xa1   : > { %v334_v26 = vsel %vm321_vm0, %v611_v24, 0.0 }
  0xa2   : > { %612 = vpow2.f32 %v332_v25  ;;  %335 = vadd.xlane.f32.xlu2 %v334_v26 }
  0xa8   : > { %v613_v27 = vpop.eup %612 }
  0xa9   : > { %v337_v28 = vsel %vm321_vm0, %v613_v27, 0.0 }
  0xaa   : > { %338 = vadd.xlane.f32.xlu2 %v337_v28 }
  0xb2   : > { %366 = vadd.xlane.f32.xlu2 %v365_v30 }
 0x10a   : > { %v344_v32 = vpop.xlane.xlu0 %343 }
 0x10b   : > { %v348_v34 = vsub.f32 %v344_v32, %v324_v11 }
 0x112   : > { %v347_v39 = vpop.xlane.xlu1 %346  ;;  %v370_v55 = vpop.xlane.xlu0 %369 }
 0x113   : > { %v349_v41 = vsub.f32 %v347_v39, %v327_v18  ;;  %v376_v59 = vsub.f32 0.0, %v370_v55 }
 0x115   : > { %v336_v31 = vpop.xlane.xlu2 %335 }
 0x116   : > { %614 = vlog2.f32 %v336_v31 }
 0x11c   : > { %v615_v33 = vpop.eup %614 }
 0x11d   : > { %v351_v35 = vmul.f32 0.6931472, %v615_v33  ;;  %v339_v36 = vpop.xlane.xlu2 %338 }
 0x11e   : > { %616 = vlog2.f32 %v339_v36 }
 0x11f   : > { %v354_v37 = vsub.f32 %v348_v34, %v351_v35 }
 0x121   : > { %v356_v38 = vmul.f32 1.442695, %v354_v37 }
 0x123   : > { %618 = vpow2.f32 %v356_v38 }
 0x124   : > { %v617_v40 = vpop.eup %616 }
 0x125   : > { %v353_v42 = vmul.f32 0.6931472, %v617_v40  ;;  %v367_v47 = vpop.xlane.xlu2 %366 }
 0x126   : > { %v375_v50 = vsub.f32 0.0, %v367_v47 }
 0x127   : > { %v355_v43 = vsub.f32 %v349_v41, %v353_v42 }
 0x129   : > { %v619_v44 = vpop.eup %618  ;;  %v358_v45 = vmul.f32 1.442695, %v355_v43 }
 0x12a   : > { %v371_v46 = vsub.f32 1.0, %v619_v44 }
 0x12b   : > { %620 = vpow2.f32 %v358_v45 }
 0x12c   : > { %v373_v48 = vmul.f32 %v371_v46, %v371_v46 }
 0x12e   : > { %v377_v53 = vmul.f32 %v375_v50, %v373_v48 }
 0x130   : > { %v379_v61 = vmul.f32 %v377_v53, %v354_v37 }
 0x131   : > { %v621_v54 = vpop.eup %620 }
 0x132   : > { %v372_v57 = vsub.f32 1.0, %v621_v54  ;;  %v392_v0 = vsel %vm390_vm3, %v379_v61, 0.0 }
 0x133   : > { %v395_v2 = vsel %vm394_vm5, %v392_v0, 0.0 }
 0x134   : > { %v374_v60 = vmul.f32 %v372_v57, %v372_v57 }
 0x136   : > { %v378_v62 = vmul.f32 %v376_v59, %v374_v60 }
 0x138   : > { %v380_v63 = vmul.f32 %v378_v62, %v355_v43 }
 0x13a   : > { %v393_v1 = vsel %vm391_vm4, %v380_v63, 0.0 }
 0x13b   : > { %v396_v3 = vsel %vm394_vm5, %v393_v1, 0.0 }
 0x13c   : > { %v397_v4 = vadd.f32 %v396_v3, %v395_v2 }
 0x13e   : > { %398 = vadd.xlane.f32.xlu2 %v397_v4 }
 0x1b1   : > { %v399_v5 = vpop.xlane.xlu2 %398 }
 0x1b2   : > { %v400_v6 = vrot.slane %v399_v5, 4 }
 0x1b4   : > { %v401_v7 = vadd.f32 %v400_v6, %v399_v5 }
 0x1b6   : > { %v402_v8 = vrot.slane %v401_v7, 2 }
 0x1b8   : > { %v403_v9 = vadd.f32 %v402_v8, %v401_v7 }
 0x1ba   : > { %v404_v10 = vrot.slane %v403_v9, 1 }
 0x1bc   : > { %v405_v11 = vadd.f32 %v404_v10, %v403_v9 }
 0x1be   : > { %532 = vpush %v405_v11 }
 0x1ef   : > { %s533_s11 = spop %532 }
 0x1f0   : > { %v408_v13 = vstv %s533_s11 }
 0x1f1   : > { %v409_v14 = vadd.f32 %v408_v13, %v407_v12 }
 0x1f3   : > { %410 = vst [vmem:[%s824_s27] sm:$0xff] %v409_v14 }
 0x1f4   : > { %649 = shalt.err (!%p646_p8)
}
 0x1f5   : > { %534 = dma.vmem_to_hbm [thread:$0]  (%p789_p3), %s425_s9, 128, %s427_s10, %s412_s20  }
 0x1f6 PF: > { %p540_p10 = scmp.ge.s32.totalorder %s716_s19, 2  ;;  %s438_s29 = sand.u32 1, %s688_s12  }
 0x1f7   : > { %s439_s27 = scalar_lea.sflag [#allocation3], %s438_s29 }
 0x1f8   : > { %p537_p11 = pnand %p540_p10, %p799_p9 }
 0x1fa   : > { %p538_p12 = pneg %p537_p11 }
 0x1fc   : > { %683 = dma.done.wait (%p538_p12), %s439_s27, 128  }
 0x1fd   : > { %685 = vsyncadd (%p538_p12), %s439_s27, 4294967168  ;;  %s16_s19 = sadd.s32 1, %s716_s19   ;;  %s895_s12 = smov %s692_s13 }
 0x1fe   : > { %p13_p13 = scmp.ge.s32.totalorder %s16_s19, 6   ;;  %s896_s13 = smov %s696_s14 }
 0x1ff   : > { %s897_s14 = smov %s807_s28  ;;  %s898_s15 = smov %s708_s17 }
 0x200   : > { %s899_s16 = smov %s712_s18  ;;  %s900_s17 = smov %s903_s22 }
 0x201   : > { %s901_s18 = smov %s907_s23  ;;  %15 = sbr.rel (!%p13_p13) target bundleno = 5 (0x5), region = 74 }
 0x206   :  { %445 = vsyncpa [#allocation3], 1 }
 0x207   :  { %447 = vsyncpa [#allocation3 + $0x1], 1 }

</bundles_post_ra>
